<compile_context>
chip_gen: v5e
topology: v5e:2x2
jax: 0.10.0
libtpu: 0.0.40
codegen_flags: <defaults>
</compile_context>

<pallas_src>
import functools

import jax
import jax.numpy as jnp
from jax import lax
from jax.experimental import pallas as pl
from jax.experimental.pallas import tpu as pltpu

_LANES = 128
_BOXES_PER_ROW = _LANES // 4      # 32 interleaved boxes per 128-lane row
_MAX_BLOCK_ROWS = 1024            # 1024 * 128 * 4B = 512 KiB per input block
_KERNEL_MIN_ROWS = 8              # below this, the pure-JAX path is cheaper


def _cdiv(a, b):
    return -(-a // b)


@functools.cache
def _lane_roll_shifts():
    """Probe pltpu.roll's rotation direction once; return shift amounts (s1, s2)
    that realize out[l] = in[(l - 1) % 128] and out[l] = in[(l - 2) % 128]."""
    def probe(x_ref, o_ref):
        o_ref[...] = pltpu.roll(x_ref[...], shift=1, axis=1)

    x = jnp.broadcast_to(jnp.arange(_LANES, dtype=jnp.float32), (8, _LANES))
    y = pl.pallas_call(
        probe, out_shape=jax.ShapeDtypeStruct((8, _LANES), jnp.float32))(x)
    if float(y[0, 1]) == 0.0:          # np.roll convention: out[1] == in[0]
        return 1, 2
    if float(y[0, 0]) == 1.0:          # opposite convention: equivalent +ve shifts
        return _LANES - 1, _LANES - 2
    raise RuntimeError("unexpected pltpu.roll semantics")


@functools.cache
def _tensorcores_per_chip():
    """2 TensorCores per chip on v7x-class parts, 1 on v5e/v6e (conservative default)."""
    try:
        info = pltpu.get_tpu_info()
        ver = str(getattr(info, "chip_version", "") or getattr(info, "version", ""))
        if "7" in ver:
            return 2
    except Exception:
        pass
    try:
        if "7" in jax.devices()[0].device_kind.lower():
            return 2
    except Exception:
        pass
    return 1


def _fold_rows(x, tm):
    """(tm, 128) -> (8, 128): tree-sum of vreg-aligned 8-row groups (pure VPU adds)."""
    parts = [x[j * 8:(j + 1) * 8] for j in range(tm // 8)]
    while len(parts) > 1:
        nxt = [parts[k] + parts[k + 1] for k in range(0, len(parts) - 1, 2)]
        if len(parts) % 2:
            nxt.append(parts[-1])
        parts = nxt
    return parts[0]


def _iou_sum_kernel(pred_ref, tgt_ref, out_ref, *, tm, nbpc, rows, eps, s1, s2):
    # pred_ref / tgt_ref: (tm, 128) blocks of the flat interleaved box buffer.
    #   lane 4k = xmax, 4k+1 = xmin, 4k+2 = ymax, 4k+3 = ymin of box k of the row.
    # out_ref: (8, 128) per-core running IoU-sum slab (output doubles as accumulator).
    c = pl.program_id(0)              # core axis (CORE_PARALLEL on v7x, extent 1 elsewhere)
    i = pl.program_id(1)              # reduction axis within a core

    @pl.when(i == 0)
    def _init():
        out_ref[...] = jnp.zeros_like(out_ref)

    pred = pred_ref[...].astype(jnp.float32)
    tgt = tgt_ref[...].astype(jnp.float32)

    # Shift max-coordinate lanes (4k, 4k+2) onto the min-coordinate lanes (4k+1, 4k+3).
    # roll(min(pred, tgt)) is derived as min of the two rolls: 5 XLU rolls total.
    pred_hi = pltpu.roll(pred, shift=s1, axis=1)   # lane 4k+1: pred_xmax, 4k+3: pred_ymax
    tgt_hi = pltpu.roll(tgt, shift=s1, axis=1)
    inter_lo = jnp.maximum(pred, tgt)              # lane 4k+1: inter_xmin, 4k+3: inter_ymin
    inter_hi = jnp.minimum(pred_hi, tgt_hi)        # == roll(min(pred, tgt), 1)

    inter_wh = jnp.maximum(inter_hi - inter_lo, 0.0)   # 4k+1: inter_w, 4k+3: inter_h
    pred_wh = jnp.maximum(pred_hi - pred, 0.0)
    tgt_wh = jnp.maximum(tgt_hi - tgt, 0.0)

    # Shift widths (lane 4k+1) onto lane 4k+3 and multiply by heights: each box's
    # areas land on lane 4k+3 of its 4-lane group.
    inter_area = inter_wh * pltpu.roll(inter_wh, shift=s2, axis=1)
    pred_area = pred_wh * pltpu.roll(pred_wh, shift=s2, axis=1)
    tgt_area = tgt_wh * pltpu.roll(tgt_wh, shift=s2, axis=1)

    union = pred_area + tgt_area - inter_area + eps
    # approx reciprocal runs on the EUP slot (>= eps for real lanes, never ~0 there).
    iou = inter_area * pl.reciprocal(union, approx=True)   # valid only at lanes 4k+3

    g = c * nbpc + i                  # global block index over the whole row range
    rem = rows - g * tm               # number of valid rows left for this block (int32)

    @pl.when(rem >= tm)
    def _interior():                  # fully valid block: no masking at all
        out_ref[...] += _fold_rows(iou, tm)

    @pl.when(rem < tm)
    def _edge():                      # partial / clamped-duplicate block: select, not mul
        ridx = lax.broadcasted_iota(jnp.int32, iou.shape, 0)
        out_ref[...] += _fold_rows(jnp.where(ridx < rem, iou, 0.0), tm)


def _iou_sum_pallas(pred2d, tgt2d, eps, num_cores):
    rows = pred2d.shape[0]
    rows_per_core = _cdiv(rows, num_cores)
    # tm: multiple of 8 and <= rows, so only standard partial edge blocks occur.
    tm = min(_MAX_BLOCK_ROWS, max(8, (rows_per_core // 8) * 8))
    nbpc = _cdiv(rows_per_core, tm)               # blocks per core
    nblocks_data = _cdiv(rows, tm)                # blocks touching real rows
    s1, s2 = _lane_roll_shifts()

    def in_index(c, i):
        g = c * nbpc + i
        # Clamp so trailing (fully masked) slots of an uneven core split never DMA
        # past the array; their contribution is zeroed in-kernel.
        return (jnp.minimum(g, nblocks_data - 1), 0)

    kernel = functools.partial(_iou_sum_kernel, tm=tm, nbpc=nbpc, rows=rows,
                               eps=float(eps), s1=s1, s2=s2)
    sems = (pltpu.CORE_PARALLEL if num_cores > 1 else pltpu.ARBITRARY,
            pltpu.ARBITRARY)
    bytes_in = 2 * rows * _LANES * pred2d.dtype.itemsize

    out = pl.pallas_call(
        kernel,
        out_shape=jax.ShapeDtypeStruct((num_cores * 8, _LANES), jnp.float32),
        grid=(num_cores, nbpc),
        in_specs=[pl.BlockSpec((tm, _LANES), in_index),
                  pl.BlockSpec((tm, _LANES), in_index)],
        out_specs=pl.BlockSpec((8, _LANES), lambda c, i: (c, 0)),
        compiler_params=pltpu.CompilerParams(dimension_semantics=sems),
        cost_estimate=pl.CostEstimate(
            flops=20 * rows * _LANES, transcendentals=rows * _LANES,
            bytes_accessed=bytes_in + num_cores * 8 * _LANES * 4),
    )(pred2d, tgt2d)

    # Only lanes l % 4 == 3 carry a real per-box IoU; other lanes hold by-products
    # (possibly inf/nan) that the strided gather excludes without any arithmetic.
    return jnp.sum(out[:, 3::4])


def _iou_sum_jax(pred, tgt, eps):
    """Pure-JAX sum of IoU over a small (k, 4) tail of boxes."""
    p = pred.astype(jnp.float32)
    t = tgt.astype(jnp.float32)
    pxmax, pxmin, pymax, pymin = (p[..., j] for j in range(4))
    txmax, txmin, tymax, tymin = (t[..., j] for j in range(4))
    iw = jnp.maximum(jnp.minimum(pxmax, txmax) - jnp.maximum(pxmin, txmin), 0.0)
    ih = jnp.maximum(jnp.minimum(pymax, tymax) - jnp.maximum(pymin, tymin), 0.0)
    inter = iw * ih
    pa = jnp.maximum(pxmax - pxmin, 0.0) * jnp.maximum(pymax - pymin, 0.0)
    ta = jnp.maximum(txmax - txmin, 0.0) * jnp.maximum(tymax - tymin, 0.0)
    return jnp.sum(inter / (pa + ta - inter + eps))


def weighted_iou_loss(pred_boxes, target_boxes, weight=1.0, eps=1e-6):
    """Pallas TPU implementation of WeightedIoULoss.forward: mean(weight * (1 - IoU)).

    `weight` is applied in the wrapper (scalar / traced scalar; no recompile)."""
    # TODO(synk): a per-box weight *tensor* (not part of the reference module) would
    # need a weighted reduction inside the kernel instead of this wrapper-side scaling.
    assert pred_boxes.shape == target_boxes.shape
    assert pred_boxes.shape[-1] == 4

    n = 1
    for d in pred_boxes.shape[:-1]:
        n *= d
    if n == 0:
        # torch: mean over an empty tensor is NaN.
        return jnp.array(jnp.nan, dtype=jnp.float32)
    assert 4 * n < 2 ** 31, "int32 row indexing inside the kernel would overflow"

    pred_b = pred_boxes.reshape(-1, 4)
    tgt_b = target_boxes.reshape(-1, 4)

    # Boxes handled by the kernel: largest prefix holding whole 128-lane rows.
    n_main = (n // _BOXES_PER_ROW) * _BOXES_PER_ROW
    if n_main < _KERNEL_MIN_ROWS * _BOXES_PER_ROW:
        n_main = 0                      # tiny input: pure-JAX is cheaper than a launch

    sum_iou = jnp.float32(0.0)

    if n_main > 0:
        rows = (4 * n_main) // _LANES
        if n_main == n:                 # aligned: free reshape, zero copies
            pred2d = pred_b.reshape(rows, _LANES)
            tgt2d = tgt_b.reshape(rows, _LANES)
        else:                           # ragged: contiguous prefix (no full jnp.pad copy)
            pred2d = pred_b[:n_main].reshape(rows, _LANES)
            tgt2d = tgt_b[:n_main].reshape(rows, _LANES)

        num_cores = _tensorcores_per_chip() if rows >= 16 else 1
        if num_cores > 1:
            try:
                sum_iou = sum_iou + _iou_sum_pallas(pred2d, tgt2d, eps, num_cores)
            except Exception:
                # Core-parallel split unavailable on this chip/runtime: 1-core grid.
                sum_iou = sum_iou + _iou_sum_pallas(pred2d, tgt2d, eps, 1)
        else:
            sum_iou = sum_iou + _iou_sum_pallas(pred2d, tgt2d, eps, 1)

    if n_main < n:                      # < 32 trailing boxes (or tiny input): JAX tail
        sum_iou = sum_iou + _iou_sum_jax(pred_b[n_main:], tgt_b[n_main:], eps)

    mean_iou = sum_iou / jnp.float32(n)
    return (weight * (1.0 - mean_iou)).astype(jnp.float32)


def _reference_loss(pred_boxes, target_boxes, weight=1.0, eps=1e-6):
    p = pred_boxes.reshape(-1, 4)
    t = target_boxes.reshape(-1, 4)
    n = p.shape[0]
    return jnp.asarray(weight * (1.0 - _iou_sum_jax(p, t, eps) / n), jnp.float32)


if __name__ == "__main__":
    key = jax.random.PRNGKey(0)
    k1, k2 = jax.random.split(key)

    def make_boxes(k, shape):
        ka, kb, kw, kh = jax.random.split(k, 4)
        xmin = jax.random.uniform(ka, shape, minval=0.0, maxval=10.0)
        ymin = jax.random.uniform(kb, shape, minval=0.0, maxval=10.0)
        w = jax.random.uniform(kw, shape, minval=0.5, maxval=5.0)
        h = jax.random.uniform(kh, shape, minval=0.5, maxval=5.0)
        # box format: [xmax, xmin, ymax, ymin]
        return jnp.stack([xmin + w, xmin, ymin + h, ymin], axis=-1)

    # approx reciprocal (EUP) => tolerances relaxed vs the exact reference.
    TOL = 5e-3

    # Main case: batch=2, 128 boxes each (n % 32 == 0 -> zero-copy, interior block).
    batch, num_boxes = 2, 128
    pred_boxes = make_boxes(k1, (batch, num_boxes))
    target_boxes = make_boxes(k2, (batch, num_boxes))
    loss = weighted_iou_loss(pred_boxes, target_boxes, weight=1.0, eps=1e-6)
    jax.block_until_ready(loss)
    ref = _reference_loss(pred_boxes, target_boxes, weight=1.0, eps=1e-6)
    assert jnp.allclose(loss, ref, rtol=TOL, atol=TOL), (loss, ref)

    # Ragged case (n % 32 != 0): kernel prefix + pure-JAX tail + in-kernel edge mask.
    pred_r = make_boxes(jax.random.fold_in(k1, 3), (2, 150))
    tgt_r = make_boxes(jax.random.fold_in(k2, 3), (2, 150))
    loss_r = weighted_iou_loss(pred_r, tgt_r, weight=0.5, eps=1e-6)
    ref_r = _reference_loss(pred_r, tgt_r, weight=0.5, eps=1e-6)
    assert jnp.allclose(loss_r, ref_r, rtol=TOL, atol=TOL), (loss_r, ref_r)

    # Multi-block case: 40960 boxes -> 1280 rows -> interior + partial blocks
    # (and the 2-core CORE_PARALLEL split when running on a v7x chip).
    k3, k4 = jax.random.split(jax.random.PRNGKey(1))
    big_pred = make_boxes(k3, (40, 1024))
    big_tgt = make_boxes(k4, (40, 1024))
    loss_b = weighted_iou_loss(big_pred, big_tgt, weight=2.0, eps=1e-6)
    ref_b = _reference_loss(big_pred, big_tgt, weight=2.0, eps=1e-6)
    assert jnp.allclose(loss_b, ref_b, rtol=TOL, atol=TOL), (loss_b, ref_b)

    print("KERNEL_OK")
</pallas_src>

<mosaic_0001>
module attributes {stable_mosaic.version = 11 : i64} {
  func.func @probe(%arg0: memref<8x128xf32, #tpu.memory_space<vmem>>, %arg1: memref<8x128xf32, #tpu.memory_space<vmem>>) attributes {dimension_semantics = [], scalar_prefetch = 0 : i64, scratch_operands = 0 : i64, tpu.core_type = #tpu.core_type<tc>} {
    %c0 = arith.constant 0 : index
    %c0_0 = arith.constant 0 : index
    %0 = vector.load %arg0[%c0, %c0_0] : memref<8x128xf32, #tpu.memory_space<vmem>>, vector<8x128xf32>
    %c1_i32 = arith.constant 1 : i32
    %1 = tpu.dynamic_rotate %0 by %c1_i32 dim 1 : vector<8x128xf32>, i32 -> vector<8x128xf32>
    %c0_1 = arith.constant 0 : index
    %c0_2 = arith.constant 0 : index
    %2 = vector.load %arg1[%c0_1, %c0_2] : memref<8x128xf32, #tpu.memory_space<vmem>>, vector<8x128xf32>
    tpu.vector_store %arg1[%c0_1, %c0_2], %1 {strides = array<i32>} : memref<8x128xf32, #tpu.memory_space<vmem>>, vector<8x128xf32>,
    return
  }
}

</mosaic_0001>

<bundles_post_ra>
// kernel: tpu_custom_call.1
= control target key start
LH: loop header
LB: loop body
LE: loop exit
PB: predicated region body
PF: predicated region fallthrough
CT: control target
= control target key end

     0   :  { %6 = vsyncpa [#allocation3], 0  ;;  %s118_s0 = inlined_call_operand.hbm [shape: f32[8,128], index: 0, kind: input, shape index: {}]   ;;  %s119_s1 = inlined_call_operand.hbm [shape: f32[8,128], index: 1, kind: output, shape index: {}]  }
   0x1   :  { %7 = vsyncpa [#allocation4], 0  ;;  %s13_s8 = sshll.u32 %s118_s0, 4  ;;  %s99_s9 = smov [#allocation2]   ;;  %s14_s8 = int_to_ptr.hbm [resolvable:$true] %s13_s8 }
   0x2   :  { %s15_s10 = sshll.u32 %s99_s9, 4  ;;  %s16_s10 = int_to_ptr.vmem [resolvable:$true] %s15_s10 }
   0x3   :  { %18 = dma.hbm_to_vmem [thread:$0]  %s14_s8, 128, %s16_s10, [#allocation3]  }
   0x4   :  { %95 = dma.done.wait [#allocation3], 128  }
   0x5   :  { %96 = vsyncadd [#allocation3], 4294967168  ;;  %v23_v0 = vld [vmem:[#allocation2] sm:$0xff]  ;;  %s100_s11 = smov 1   ;;  %s101_s12 = smov [#allocation5]  }
   0x6   :  { %24 = vrot.lane.b32.xlu0 %v23_v0, %s100_s11  ;;  %s32_s13 = sshll.u32 %s101_s12, 4  ;;  %s34_s16 = sshll.u32 %s119_s1, 4  ;;  %s33_s13 = int_to_ptr.vmem [resolvable:$true] %s32_s13  ;;  %s35_s16 = int_to_ptr.hbm [resolvable:$true] %s34_s16 }
  0x78   :  { %v25_v1 = vpop.permute.xlu0 %24 }
  0x79   :  { %26 = vst [vmem:[#allocation5] sm:$0xff] %v25_v1 }
  0x7a   :  { %37 = dma.vmem_to_hbm [thread:$0]  %s33_s13, 128, %s35_s16, [#allocation4]  }
  0x7b   :  { %97 = dma.done.wait [#allocation4], 128  }
  0x7c   :  { %98 = vsyncadd [#allocation4], 4294967168 }
  0x7d   :  { %42 = vsyncpa [#allocation3], 1 }
  0x7e   :  { %43 = vsyncpa [#allocation4], 1 }

</bundles_post_ra>
